<compile_context>
chip_gen: v7x
topology: tpu7x:2x2x1
jax: 0.10.0
libtpu: 0.0.40
codegen_flags: <defaults>
</compile_context>

<pallas_src>
import functools

import jax
import jax.numpy as jnp
from jax.experimental import pallas as pl
from jax.experimental.pallas import tpu as pltpu


# ----------------------------------------------------------------------------
# Helpers
# ----------------------------------------------------------------------------
def _round_up(x, m):
    return (x + m - 1) // m * m


_VMEM_LIMIT_CACHE = None


def _vmem_limit():
    """Generation-aware VMEM budget (v5e/v6e: 128 MiB, v7x: 64 MiB per TC)."""
    global _VMEM_LIMIT_CACHE
    if _VMEM_LIMIT_CACHE is None:
        limit = 48 * 1024 * 1024          # safe everywhere (v7x per-TC)
        try:
            kind = jax.devices()[0].device_kind.lower()
            if "v5" in kind or "v6" in kind:
                limit = 100 * 1024 * 1024  # use the bigger 128 MiB VMEM
        except Exception:
            pass
        _VMEM_LIMIT_CACHE = limit
    return _VMEM_LIMIT_CACHE


# ----------------------------------------------------------------------------
# Fused matmul kernel:  y = relu?((x @ w_scaled) + bias [+ residual])
#   - bf16 inputs, f32 accumulation inside the kernel, bf16 output
#   - BN scale is pre-folded into w, so epilogue is bias/residual/ReLU only
#   - K is NOT split: one dot + epilogue per (m, n) output block
# ----------------------------------------------------------------------------
def _mm_bias_kernel(x_ref, w_ref, b_ref, *rest, relu, has_res):
    if has_res:
        id_ref, o_ref = rest
    else:
        (o_ref,) = rest

    acc = jnp.dot(x_ref[...], w_ref[...], preferred_element_type=jnp.float32)
    y = acc + b_ref[...]
    if has_res:
        y = y + id_ref[...].astype(jnp.float32)
    if relu:
        y = jnp.maximum(y, 0.0)
    o_ref[...] = y.astype(o_ref.dtype)


def matmul_bias(x, w, bias, n_out, relu=False, residual=None):
    """y = relu?((x @ w) + bias [+ residual]) -> bf16 (M, n_out).

    x: (M, K) float; w: (K, Np) bf16 (pre-padded, BN scale folded);
    bias: (1, Np) f32; residual: (M, n_out) or None.
    """
    M, K = x.shape
    Np = w.shape[1]

    Mp = _round_up(M, 16)
    # M-aware tiling: tiny-M layers collapse to a single M tile.
    if Mp > 512 and Mp % 512 == 0:
        tm = 512
    elif Mp > 256 and Mp % 256 == 0:
        tm = 256
    else:
        tm = Mp
    num_m = Mp // tm

    tn = min(Np, 1024)
    # v7x has 2 TensorCores: keep >= 2 parallel tiles when M gives only one.
    if num_m == 1 and Np // tn < 2 and Np >= 256:
        tn = Np // 2
    num_n = Np // tn

    xp = x.astype(jnp.bfloat16)
    if Mp != M:
        xp = jnp.pad(xp, ((0, Mp - M), (0, 0)))

    has_res = residual is not None
    inputs = [xp, w, bias]
    in_specs = [
        pl.BlockSpec((tm, K), lambda m, n: (m, 0)),
        pl.BlockSpec((K, tn), lambda m, n: (0, n)),
        pl.BlockSpec((1, tn), lambda m, n: (0, n)),
    ]
    if has_res:
        rp = residual.astype(jnp.bfloat16)
        pad_r = Mp - rp.shape[0]
        pad_c = Np - rp.shape[1]
        if pad_r or pad_c:
            rp = jnp.pad(rp, ((0, pad_r), (0, pad_c)))
        inputs.append(rp)
        in_specs.append(pl.BlockSpec((tm, tn), lambda m, n: (m, n)))

    out = pl.pallas_call(
        functools.partial(_mm_bias_kernel, relu=relu, has_res=has_res),
        out_shape=jax.ShapeDtypeStruct((Mp, Np), jnp.bfloat16),
        grid_spec=pltpu.PrefetchScalarGridSpec(
            num_scalar_prefetch=0,
            grid=(num_m, num_n),
            in_specs=in_specs,
            out_specs=pl.BlockSpec((tm, tn), lambda m, n: (m, n)),
        ),
        compiler_params=pltpu.CompilerParams(
            dimension_semantics=("parallel", "parallel"),
            vmem_limit_bytes=_vmem_limit()),
    )(*inputs)
    return out[:M, :n_out]


# ----------------------------------------------------------------------------
# MaxPool2d(kernel=3, stride=2, padding=1)  -- lane-dense element-wise max
# ----------------------------------------------------------------------------
def _maxpool9_kernel(*refs):
    o_ref = refs[-1]
    m = refs[0][...]
    for r in refs[1:-1]:
        m = jnp.maximum(m, r[...])
    o_ref[...] = m


def maxpool3x3_s2(x):
    """MaxPool2d(3, stride=2, padding=1) on NHWC (bf16)."""
    N, H, W, C = x.shape
    xp = jnp.pad(x, ((0, 0), (1, 1), (1, 1), (0, 0)),
                 constant_values=float("-inf"))
    OH = (H + 2 - 3) // 2 + 1
    OW = (W + 2 - 3) // 2 + 1
    M = N * OH * OW

    # 9 shifted strided views -> element-wise maximum tree on the VPU.
    views = []
    for i in range(3):
        for j in range(3):
            views.append(
                xp[:, i:i + 2 * OH:2, j:j + 2 * OW:2, :].reshape(M, C))

    # Lane-dense repack: (M, C) -> (M*C/128, 128) when it divides evenly.
    total = M * C
    if total % 128 == 0:
        R, Cb = total // 128, 128
        views = [v.reshape(R, Cb) for v in views]
    else:
        R, Cb = M, C

    tr = min(512, _round_up(R, 8))
    Rp = _round_up(R, tr)
    if Rp != R:
        views = [jnp.pad(v, ((0, Rp - R), (0, 0))) for v in views]

    spec = pl.BlockSpec((tr, Cb), lambda i: (i, 0))
    out = pl.pallas_call(
        _maxpool9_kernel,
        out_shape=jax.ShapeDtypeStruct((Rp, Cb), x.dtype),
        grid_spec=pltpu.PrefetchScalarGridSpec(
            num_scalar_prefetch=0,
            grid=(Rp // tr,),
            in_specs=[spec] * 9,
            out_specs=spec),
        compiler_params=pltpu.CompilerParams(
            dimension_semantics=("arbitrary",),
            vmem_limit_bytes=_vmem_limit()),
    )(*views)
    return out.reshape(-1)[:total].reshape(N, OH, OW, C)


# ----------------------------------------------------------------------------
# Fused head: global average pool + fc (bias)  -> f32 logits
# ----------------------------------------------------------------------------
def _head_kernel(x_ref, w_ref, b_ref, o_ref):
    xm = jnp.mean(x_ref[...].astype(jnp.float32), axis=1)          # (N, C)
    y = jnp.dot(xm.astype(jnp.bfloat16), w_ref[...],
                preferred_element_type=jnp.float32)
    o_ref[...] = y + b_ref[...]


def head(x, fc):
    """AdaptiveAvgPool2d((1,1)) + Linear on NHWC -> (N, num_classes) f32."""
    N, H, W, C = x.shape
    xr = x.reshape(N, H * W, C).astype(jnp.bfloat16)
    w, b = fc["w"], fc["b"]                                          # (C,Np), (1,Np)
    Np = w.shape[1]
    out = pl.pallas_call(
        _head_kernel,
        out_shape=jax.ShapeDtypeStruct((N, Np), jnp.float32),
        grid_spec=pltpu.PrefetchScalarGridSpec(
            num_scalar_prefetch=0,
            grid=(1,),
            in_specs=[pl.BlockSpec((N, H * W, C), lambda i: (0, 0, 0)),
                      pl.BlockSpec((C, Np), lambda i: (0, 0)),
                      pl.BlockSpec((1, Np), lambda i: (0, 0))],
            out_specs=pl.BlockSpec((N, Np), lambda i: (0, 0))),
        compiler_params=pltpu.CompilerParams(
            dimension_semantics=("arbitrary",),
            vmem_limit_bytes=_vmem_limit()),
    )(xr, w, b)
    return out[:, :fc["nout"]]


# ----------------------------------------------------------------------------
# Conv wrappers (glue: patch extraction / reshape; compute in Pallas matmul)
# ----------------------------------------------------------------------------
def _im2col(x, K, stride, pad):
    """x: (N,H,W,C) bf16 -> patches (N*OH*OW, K*K*C)."""
    N, H, W, C = x.shape
    xp = jnp.pad(x, ((0, 0), (pad, pad), (pad, pad), (0, 0)))
    OH = (H + 2 * pad - K) // stride + 1
    OW = (W + 2 * pad - K) // stride + 1
    cols = []
    for i in range(K):
        for j in range(K):
            cols.append(xp[:, i:i + stride * OH:stride,
                           j:j + stride * OW:stride, :])
    patches = jnp.stack(cols, axis=3)             # (N, OH, OW, K*K, C)
    return patches.reshape(N * OH * OW, K * K * C), OH, OW


def conv_bn(x, cp, stride, pad, relu, residual=None):
    """Conv2d + folded BN (scale pre-folded into weight) (+residual) (+ReLU)."""
    K, Cout = cp["k"], cp["cout"]
    N, H, W, Cin = x.shape
    if K == 1 and pad == 0:
        xs = x[:, ::stride, ::stride, :]
        OH, OW = xs.shape[1], xs.shape[2]
        xm = xs.reshape(-1, Cin)
    else:
        xm, OH, OW = _im2col(x, K, stride, pad)
    res = residual.reshape(-1, Cout) if residual is not None else None
    y = matmul_bias(xm, cp["w"], cp["b"], Cout, relu=relu, residual=res)
    return y.reshape(N, OH, OW, Cout)


# ----------------------------------------------------------------------------
# Deterministic parameter construction (ResNet-50, fc -> 38)
# Weights are pre-transposed / BN-scale-folded / padded / bf16-cast ONCE here.
# ----------------------------------------------------------------------------
_LAYER_CFG = [(64, 3, 1), (128, 4, 2), (256, 6, 2), (512, 3, 2)]
_EXPANSION = 4
_NUM_CLASSES = 38


def _conv_w(key, cout, cin, k):
    fan_in = cin * k * k
    return jax.random.normal(key, (cout, cin, k, k), jnp.float32) * jnp.sqrt(
        2.0 / fan_in)


def _bn_folded(key, c, eps=1e-5):
    k1, k2, k3 = jax.random.split(key, 3)
    gamma = jax.random.uniform(k1, (c,), jnp.float32, 0.9, 1.1)
    beta = jax.random.normal(k2, (c,), jnp.float32) * 0.01
    mean = jax.random.normal(k3, (c,), jnp.float32) * 0.01
    var = jnp.ones((c,), jnp.float32)
    scale = gamma / jnp.sqrt(var + eps)
    bias = beta - mean * scale
    return scale, bias


def _prep_conv(w_oihw, scale, bias):
    """(Cout,Cin,K,K) f32 weight + BN scale/bias -> matmul-ready bf16 weight."""
    Cout, Cin, K, _ = w_oihw.shape
    wm = jnp.transpose(w_oihw, (2, 3, 1, 0)).reshape(K * K * Cin, Cout)
    wm = wm * scale[None, :]                       # fold BN scale into weight
    Np = _round_up(Cout, 128)
    if Np != Cout:
        wm = jnp.pad(wm, ((0, 0), (0, Np - Cout)))
        bias = jnp.pad(bias, (0, Np - Cout))
    return {"w": wm.astype(jnp.bfloat16),
            "b": bias.reshape(1, Np).astype(jnp.float32),
            "k": int(K), "cout": int(Cout)}


def make_params(key):
    keys = iter(jax.random.split(key, 512))
    params = {}
    w = _conv_w(next(keys), 64, 3, 7)
    s, b = _bn_folded(next(keys), 64)
    params["conv1"] = _prep_conv(w, s, b)

    in_c = 64
    layers = []
    for planes, blocks, _ in _LAYER_CFG:
        blk_list = []
        for bi in range(blocks):
            p = {}
            w = _conv_w(next(keys), planes, in_c, 1)
            s, b = _bn_folded(next(keys), planes)
            p["c1"] = _prep_conv(w, s, b)
            w = _conv_w(next(keys), planes, planes, 3)
            s, b = _bn_folded(next(keys), planes)
            p["c2"] = _prep_conv(w, s, b)
            w = _conv_w(next(keys), planes * _EXPANSION, planes, 1)
            s, b = _bn_folded(next(keys), planes * _EXPANSION)
            p["c3"] = _prep_conv(w, s, b)
            if bi == 0:  # downsample branch (stride and/or channel change)
                w = _conv_w(next(keys), planes * _EXPANSION, in_c, 1)
                s, b = _bn_folded(next(keys), planes * _EXPANSION)
                p["cd"] = _prep_conv(w, s, b)
            in_c = planes * _EXPANSION
            blk_list.append(p)
        layers.append(blk_list)
    params["layers"] = layers

    fw = jax.random.normal(next(keys), (512 * _EXPANSION, _NUM_CLASSES),
                           jnp.float32) / jnp.sqrt(512 * _EXPANSION)
    fb = jnp.zeros((_NUM_CLASSES,), jnp.float32)
    Np = _round_up(_NUM_CLASSES, 128)
    params["fc"] = {
        "w": jnp.pad(fw, ((0, 0), (0, Np - _NUM_CLASSES))).astype(jnp.bfloat16),
        "b": jnp.pad(fb, (0, Np - _NUM_CLASSES)).reshape(1, Np),
        "nout": _NUM_CLASSES,
    }
    return params


# ----------------------------------------------------------------------------
# Forward pass
# ----------------------------------------------------------------------------
def _bottleneck(x, p, stride):
    identity = x
    out = conv_bn(x, p["c1"], 1, 0, relu=True)
    out = conv_bn(out, p["c2"], stride, 1, relu=True)
    if "cd" in p:
        identity = conv_bn(x, p["cd"], stride, 0, relu=False)
    # conv3 + BN + residual add + ReLU fused into one matmul epilogue.
    out = conv_bn(out, p["c3"], 1, 0, relu=True, residual=identity)
    return out


def plant_disease_forward(params, xb_nchw):
    """xb_nchw: (N, 3, H, W) float32 -> logits (N, 38) float32."""
    x = jnp.transpose(xb_nchw, (0, 2, 3, 1)).astype(jnp.bfloat16)  # NCHW->NHWC
    x = conv_bn(x, params["conv1"], stride=2, pad=3, relu=True)
    x = maxpool3x3_s2(x)

    for (planes, blocks, layer_stride), blk_list in zip(_LAYER_CFG,
                                                        params["layers"]):
        for bi, p in enumerate(blk_list):
            stride = layer_stride if bi == 0 else 1
            x = _bottleneck(x, p, stride)

    return head(x, params["fc"])                   # avgpool + fc fused


# ----------------------------------------------------------------------------
if __name__ == "__main__":
    key = jax.random.PRNGKey(0)
    pkey, xkey = jax.random.split(key)

    params = make_params(pkey)
    # Small ResNet-compatible input: batch=2, 3 channels, 64x64 spatial (NCHW).
    xb = jax.random.normal(xkey, (2, 3, 64, 64), jnp.float32)

    logits = plant_disease_forward(params, xb)
    logits = jax.block_until_ready(logits)

    assert logits.shape == (2, 38), logits.shape
    assert bool(jnp.all(jnp.isfinite(logits)))
    print("KERNEL_OK")
</pallas_src>

<mosaic_0001>
module attributes {stable_mosaic.version = 11 : i64} {
  func.func @_mm_bias_kernel(%arg0: i32, %arg1: i32, %arg2: memref<512x147xbf16, #tpu.memory_space<vmem>>, %arg3: memref<147x128xbf16, #tpu.memory_space<vmem>>, %arg4: memref<1x128xf32, #tpu.memory_space<vmem>>, %arg5: memref<512x128xbf16, #tpu.memory_space<vmem>>) attributes {dimension_semantics = [#tpu.dimension_semantics<parallel>, #tpu.dimension_semantics<parallel>], iteration_bounds = array<i64: 4, 1>, scalar_prefetch = 0 : i64, scratch_operands = 0 : i64, tpu.core_type = #tpu.core_type<tc>, window_params = [{transform_indices = @transform_0, window_bounds = array<i64: 512, 147>}, {transform_indices = @transform_1, window_bounds = array<i64: 147, 128>}, {transform_indices = @transform_2, window_bounds = array<i64: 1, 128>}, {transform_indices = @transform_3, window_bounds = array<i64: 512, 128>}]} {
    %c0 = arith.constant 0 : index
    %c0_0 = arith.constant 0 : index
    %0 = vector.load %arg2[%c0, %c0_0] : memref<512x147xbf16, #tpu.memory_space<vmem>>, vector<512x147xbf16>
    %c0_1 = arith.constant 0 : index
    %c0_2 = arith.constant 0 : index
    %1 = vector.load %arg3[%c0_1, %c0_2] : memref<147x128xbf16, #tpu.memory_space<vmem>>, vector<147x128xbf16>
    %cst = arith.constant dense<0.000000e+00> : vector<512x128xf32>
    %2 = tpu.matmul %0, %1, %cst {dimension_numbers = #tpu.dot_dimension_numbers<[1], [0], [0], [1], [0, 0, 1, 1], [], []>} : vector<512x147xbf16>, vector<147x128xbf16>, vector<512x128xf32> -> vector<512x128xf32>
    %c0_3 = arith.constant 0 : index
    %c0_4 = arith.constant 0 : index
    %3 = vector.load %arg4[%c0_3, %c0_4] : memref<1x128xf32, #tpu.memory_space<vmem>>, vector<1x128xf32>
    %4 = vector.broadcast %3 : vector<1x128xf32> to vector<512x128xf32>
    %5 = arith.addf %2, %4 : vector<512x128xf32>
    %cst_5 = arith.constant 0.000000e+00 : f32
    %6 = vector.broadcast %cst_5 : f32 to vector<512x128xf32>
    %7 = arith.maximumf %5, %6 : vector<512x128xf32>
    %8 = arith.truncf %7 : vector<512x128xf32> to vector<512x128xbf16>
    %c0_6 = arith.constant 0 : index
    %c0_7 = arith.constant 0 : index
    %9 = vector.load %arg5[%c0_6, %c0_7] : memref<512x128xbf16, #tpu.memory_space<vmem>>, vector<512x128xbf16>
    tpu.vector_store %arg5[%c0_6, %c0_7], %8 {strides = array<i32>} : memref<512x128xbf16, #tpu.memory_space<vmem>>, vector<512x128xbf16>,
    return
  }
  func.func @transform_0(%arg0: i32, %arg1: i32) -> (i32, i32) {
    %c0_i32 = arith.constant 0 : i32
    %c0_i32_0 = arith.constant 0 : i32
    return %arg0, %c0_i32 : i32, i32
  }
  func.func @transform_1(%arg0: i32, %arg1: i32) -> (i32, i32) {
    %c0_i32 = arith.constant 0 : i32
    %c0_i32_0 = arith.constant 0 : i32
    return %c0_i32, %arg1 : i32, i32
  }
  func.func @transform_2(%arg0: i32, %arg1: i32) -> (i32, i32) {
    %c0_i32 = arith.constant 0 : i32
    %c0_i32_0 = arith.constant 0 : i32
    return %c0_i32, %arg1 : i32, i32
  }
  func.func @transform_3(%arg0: i32, %arg1: i32) -> (i32, i32) {
    %c0_i32 = arith.constant 0 : i32
    return %arg0, %arg1 : i32, i32
  }
}

</mosaic_0001>

<bundles_post_ra>
// kernel: tpu_custom_call.1
= control target key start
LH: loop header
LB: loop body
LE: loop exit
PB: predicated region body
PF: predicated region fallthrough
CT: control target
= control target key end

     0   :  { %8 = vsyncpa [#allocation3], 0  ;;  %s2631_s0 = inlined_call_operand.vmem [shape: bf16[2048,147], index: 0, kind: input, shape index: {}]   ;;  %s2632_s1 = inlined_call_operand.vmem [shape: bf16[147,128], index: 1, kind: input, shape index: {}]   ;;  %s2633_s2 = inlined_call_operand.vmem [shape: f32[1,128], index: 2, kind: input, shape index: {}]   ;;  %s2634_s3 = inlined_call_operand.hbm [shape: bf16[2048,128], index: 3, kind: output, shape index: {}]  }
   0x1   :  { %10 = vsyncpa [#allocation3 + $0x1], 0  ;;  %s2281_s12 = smov 0   ;;  %s2283_s13 = smov 0  }
   0x2   :  { %s2285_s14 = smov 0   ;;  %s2287_s15 = smov 0  }
   0x3   :  { %s2289_s16 = smov 0   ;;  %s2291_s17 = smov 0  }
   0x4 LB: > { %s1547_s18 = sadd.s32 4294967295, %s2254_s17   ;;  %s1548_s19 = sadd.s32 4294967294, %s2254_s17   ;;  %s2254_s17 = sphi %s2291_s17, %s16_s17   ;;  %s2250_s16 = sphi %s2289_s16, %s2641_s16   ;;  %s2246_s15 = sphi %s2287_s15, %s2640_s15   ;;  %s2242_s14 = sphi %s2285_s14, %s2639_s14   ;;  %s2238_s13 = sphi %s2283_s13, %s2638_s13   ;;  %s2234_s12 = sphi %s2281_s12, %s2637_s12  }
   0x5   : > { %s28_s20 = sadd.s32 1, %s2250_s16  ;;  %s115_s21 = sadd.s32 1, %s2242_s14 }
   0x6   : > { %p30_p0 = scmp.ge.s32.totalorder %s28_s20, 4  ;;  %p125_p1 = scmp.ne.s32.totalorder %s2242_s14, %s2238_s13 }
   0x7   : > { %p126_p2 = scmp.eq.s32.totalorder %s1547_s18, 3  ;;  %p131_p3 = scmp.ne.s32.totalorder %s2238_s13, %s2234_s12 }
   0x8   : > { %s2643_s20 = smov (%p30_p0, %s28_s20), 0  ;;  %p132_p5 = scmp.eq.s32.totalorder %s1548_s19, 3 }
   0x9   : > { %p2321_p4 = por %p126_p2, %p125_p1  ;;  %s110_s23 = ssub.s32 %s2250_s16, %s2643_s20 }
   0xa   : > { %p1553_p6 = scmp.ge.s32.totalorder %s2254_s17, 1  ;;  %p113_p7 = scmp.eq.s32.totalorder %s110_s23, 0 }
   0xb   : > { %p2328_p8 = por %p132_p5, %p131_p3  ;;  %p173_p9 = scmp.lt.s32.totalorder %s2254_s17, 5 }
   0xc   : > { %s2334_s25 = scalar_select %p113_p7, %s2242_s14, %s115_s21  }
   0xd   : > { %p174_p10 = pnand %p1553_p6, %p173_p9 }
   0xe   : > { %v2070_v0 = vld [vmem:[%s2632_s1] sm:$0xff] (!%p174_p10)   ;;  %v2256_v1 = vmov (!%p174_p10), 0   ;;  %v2071_v2 = vld [vmem:[%s2632_s1 + $0x8] sm:$0xff] (!%p174_p10)   ;;  %v2072_v3 = vld [vmem:[%s2632_s1 + $0x10] sm:$0xff] (!%p174_p10)   ;;  %s1555_s5 = sshll.u32 (!%p174_p10), %s2246_s15, 6  ;;  %vm656_vm0 = vcmask (!%p174_p10), 154624  }
   0xf   : > { %177 = sbr.rel (%p174_p10) target bundleno = 410 (0x19a), region = 32  ;;  %760 = vmatprep.subr.bf16.mxu0 (!%p174_p10), %v2256_v1  ;;  %1991 = vmatprep.subr.bf16.mxu1 (!%p174_p10), %v2256_v1  ;;  %p206_p11 = scmp.lt.s32.totalorder (!%p174_p10), %s1555_s5, 255  ;;  %v2073_v4 = vld [vmem:[%s2632_s1 + $0x18] sm:$0xff] (!%p174_p10)   ;;  %v2074_v5 = vld [vmem:[%s2632_s1 + $0x20] sm:$0xff] (!%p174_p10)   ;;  %v2075_v8 = vld [vmem:[%s2632_s1 + $0x28] sm:$0xff] (!%p174_p10)   ;;  %vm753_vm1 = vcmask (!%p174_p10), 1040384  }
  0x10   : > { %761 = vmatpush1.bf16.msra.mxu0 (!%p174_p10), %v2070_v0  ;;  %2001 = vmatpush1.bf16.msra.mxu1 (!%p174_p10), %v2070_v0  ;;  %v2076_v9 = vld [vmem:[%s2632_s1 + $0x30] sm:$0xff] (!%p174_p10)   ;;  %v2077_v10 = vld [vmem:[%s2632_s1 + $0x38] sm:$0xff] (!%p174_p10)   ;;  %vm754_vm2 = vcmask (!%p174_p10), 1041408   ;;  %v2257_v11 = vmov (!%p174_p10), 65535   ;;  %v2078_v13 = vld [vmem:[%s2632_s1 + $0x40] sm:$0xff] (!%p174_p10)   ;;  %s202_s9 = sand.u32 (!%p174_p10), 1, %s2238_s13  }
  0x11   : > { %762 = vmatprep.subr.bf16.mxu0 (!%p174_p10), %v2256_v1  ;;  %1992 = vmatprep.subr.bf16.mxu1 (!%p174_p10), %v2256_v1  ;;  %v755_v12 = vsel (!%p174_p10), %vm753_vm1, 4294967295, %v2257_v11  ;;  %v2079_v14 = vld [vmem:[%s2632_s1 + $0x48] ss:$0 sps:$4 sm:$0x33] (!%p174_p10)   ;;  %s1554_s10 = sshll.u32 (!%p174_p10), %s202_s9, 8  ;;  %s1799_s18 = sshll.u32 (!%p174_p10), %s2246_s15, 12 }
  0x12   : > { %v756_v15 = vsel (!%p174_p10), %vm754_vm2, %v755_v12, 0  ;;  %s2577_s26 = scalar_lea.hbm (!%p174_p10), %s2634_s3, %s1799_s18  ;;  %s2585_s15 = scalar_lea.sflag (!%p174_p10), [#allocation3], %s202_s9 }
  0x13   : > { %v758_v16 = vand.u32 (!%p174_p10), %v2079_v14, %v756_v15  ;;  %v2471_v15 = vld [vmem:[%s2633_s2] ss:$0 sm:$0xff] (!%p174_p10)  ;;  %s2258_s28 = smov (!%p174_p10), [#allocation2]  }
  0x14   : > { %763 = vmatpush1.bf16.msra.mxu0 (!%p174_p10), %v2071_v2  ;;  %2002 = vmatpush1.bf16.msra.mxu1 (!%p174_p10), %v2071_v2  ;;  %s2180_s29 = sshll.u32 (!%p174_p10), %s2258_s28, 4  ;;  %s2181_s29 = int_to_ptr.vmem [resolvable:$false] %s2180_s29 }
  0x15   : > { %764 = vmatprep.subr.bf16.mxu0 (!%p174_p10), %v2256_v1  ;;  %1993 = vmatprep.subr.bf16.mxu1 (!%p174_p10), %v2256_v1  ;;  %s2182_s30 = scalar_lea.vmem (!%p174_p10), %s2181_s29, 8192 }
  0x16   : > { %s2645_s5 = smov (!%p206_p11, %s1555_s5), 255 }
  0x17   : > { %s1734_s8 = sshll.u32 %s2645_s5, 3 }
  0x18   : > { %765 = vmatpush1.bf16.msra.mxu0 %v2072_v3  ;;  %2003 = vmatpush1.bf16.msra.mxu1 %v2072_v3  ;;  %s2352_s11 = scalar_lea.vmem %s2631_s0, %s1734_s8 }
  0x19   : > { %766 = vmatprep.subr.bf16.mxu0 %v2256_v1  ;;  %1994 = vmatprep.subr.bf16.mxu1 %v2256_v1  ;;  %v2082_v6 = vld [vmem:[%s2352_s11 + $0x4] ss:$8 sps:$4 sm:$0xff]   ;;  %v2080_v17 = vld [vmem:[%s2352_s11] ss:$8 sps:$4 sm:$0xff]   ;;  %v2086_v19 = vld [vmem:[%s2352_s11 + $0x14] ss:$8 sps:$4 sm:$0xff]  }
  0x1a   : > { %v2085_v7 = vld [vmem:[%s2352_s11 + $0x104] ss:$8 sps:$4 sm:$0xff]   ;;  %1633 = vmatprep.mubr.msk.bf16.mxu0 %vm656_vm0, %v2082_v6  ;;  %v2083_v18 = vld [vmem:[%s2352_s11 + $0x100] ss:$8 sps:$4 sm:$0xff]   ;;  %v2088_v20 = vld [vmem:[%s2352_s11 + $0x114] ss:$8 sps:$4 sm:$0xff]  }
  0x1b   : > { %1649 = vmatprep.mubr.msk.bf16.mxu1 %vm656_vm0, %v2085_v7  ;;  %v2090_v21 = vld [vmem:[%s2352_s11 + $0x10] ss:$8 sps:$4 sm:$0xff]   ;;  %v2092_v23 = vld [vmem:[%s2352_s11 + $0x24] ss:$8 sps:$4 sm:$0xff]   ;;  %v2096_v25 = vld [vmem:[%s2352_s11 + $0x20] ss:$8 sps:$4 sm:$0xff]  }
  0x1c   : > { %767 = vmatpush1.bf16.msra.mxu0 %v2073_v4  ;;  %2004 = vmatpush1.bf16.msra.mxu1 %v2073_v4  ;;  %v2091_v22 = vld [vmem:[%s2352_s11 + $0x110] ss:$8 sps:$4 sm:$0xff]   ;;  %v2094_v24 = vld [vmem:[%s2352_s11 + $0x124] ss:$8 sps:$4 sm:$0xff]   ;;  %v2097_v26 = vld [vmem:[%s2352_s11 + $0x120] ss:$8 sps:$4 sm:$0xff]  }
  0x1d   : > { %768 = vmatprep.subr.bf16.mxu0 %v2256_v1  ;;  %1995 = vmatprep.subr.bf16.mxu1 %v2256_v1  ;;  %v2098_v27 = vld [vmem:[%s2352_s11 + $0x34] ss:$8 sps:$4 sm:$0xff]   ;;  %v2102_v29 = vld [vmem:[%s2352_s11 + $0x30] ss:$8 sps:$4 sm:$0xff]   ;;  %v2104_v31 = vld [vmem:[%s2352_s11 + $0x44] ss:$8 sps:$4 sm:$0xff]  }
  0x1e   : > { %v2100_v28 = vld [vmem:[%s2352_s11 + $0x134] ss:$8 sps:$4 sm:$0xff]   ;;  %v2103_v30 = vld [vmem:[%s2352_s11 + $0x130] ss:$8 sps:$4 sm:$0xff]   ;;  %v2106_v32 = vld [vmem:[%s2352_s11 + $0x144] ss:$8 sps:$4 sm:$0xff]  }
  0x1f   : > { %v2108_v33 = vld [vmem:[%s2352_s11 + $0x40] ss:$8 sps:$4 sm:$0xff]   ;;  %v2110_v35 = vld [vmem:[%s2352_s11 + $0x54] ss:$8 sps:$4 sm:$0xff]   ;;  %v2114_v37 = vld [vmem:[%s2352_s11 + $0x50] ss:$8 sps:$4 sm:$0xff]  }
  0x20   : > { %769 = vmatpush1.bf16.msra.mxu0 %v2074_v5  ;;  %2005 = vmatpush1.bf16.msra.mxu1 %v2074_v5  ;;  %v2109_v34 = vld [vmem:[%s2352_s11 + $0x140] ss:$8 sps:$4 sm:$0xff]   ;;  %v2112_v36 = vld [vmem:[%s2352_s11 + $0x154] ss:$8 sps:$4 sm:$0xff]   ;;  %v2115_v38 = vld [vmem:[%s2352_s11 + $0x150] ss:$8 sps:$4 sm:$0xff]  }
  0x21   : > { %770 = vmatprep.subr.bf16.mxu0 %v2256_v1  ;;  %1996 = vmatprep.subr.bf16.mxu1 %v2256_v1  ;;  %v2116_v39 = vld [vmem:[%s2352_s11 + $0x64] ss:$8 sps:$4 sm:$0xff]   ;;  %v2120_v41 = vld [vmem:[%s2352_s11 + $0x60] ss:$8 sps:$4 sm:$0xff]   ;;  %v2122_v43 = vld [vmem:[%s2352_s11 + $0x74] ss:$8 sps:$4 sm:$0xff]  }
  0x22   : > { %v2118_v40 = vld [vmem:[%s2352_s11 + $0x164] ss:$8 sps:$4 sm:$0xff]   ;;  %v2121_v42 = vld [vmem:[%s2352_s11 + $0x160] ss:$8 sps:$4 sm:$0xff]   ;;  %v2124_v44 = vld [vmem:[%s2352_s11 + $0x174] ss:$8 sps:$4 sm:$0xff]  }
  0x23   : > { %v2126_v45 = vld [vmem:[%s2352_s11 + $0x70] ss:$8 sps:$4 sm:$0xff]   ;;  %v2128_v47 = vld [vmem:[%s2352_s11 + $0x84] ss:$8 sps:$4 sm:$0xff]   ;;  %v2132_v49 = vld [vmem:[%s2352_s11 + $0x80] ss:$8 sps:$4 sm:$0xff]  }
  0x24   : > { %771 = vmatpush1.bf16.msra.mxu0 %v2075_v8  ;;  %2006 = vmatpush1.bf16.msra.mxu1 %v2075_v8  ;;  %v2127_v46 = vld [vmem:[%s2352_s11 + $0x170] ss:$8 sps:$4 sm:$0xff]   ;;  %v2130_v48 = vld [vmem:[%s2352_s11 + $0x184] ss:$8 sps:$4 sm:$0xff]   ;;  %v2133_v50 = vld [vmem:[%s2352_s11 + $0x180] ss:$8 sps:$4 sm:$0xff]  }
  0x25   : > { %772 = vmatprep.subr.bf16.mxu0 %v2256_v1  ;;  %1997 = vmatprep.subr.bf16.mxu1 %v2256_v1  ;;  %v2134_v51 = vld [vmem:[%s2352_s11 + $0x94] ss:$8 sps:$4 sm:$0xff]   ;;  %v2138_v53 = vld [vmem:[%s2352_s11 + $0x90] ss:$8 sps:$4 sm:$0xff]   ;;  %v2140_v55 = vld [vmem:[%s2352_s11 + $0xa4] ss:$8 sps:$4 sm:$0xff]  }
  0x26   : > { %v2136_v52 = vld [vmem:[%s2352_s11 + $0x194] ss:$8 sps:$4 sm:$0xff]   ;;  %v2139_v54 = vld [vmem:[%s2352_s11 + $0x190] ss:$8 sps:$4 sm:$0xff]   ;;  %v2142_v56 = vld [vmem:[%s2352_s11 + $0x1a4] ss:$8 sps:$4 sm:$0xff]  }
  0x27   : > { %v2144_v57 = vld [vmem:[%s2352_s11 + $0xa0] ss:$8 sps:$4 sm:$0xff]   ;;  %v2146_v59 = vld [vmem:[%s2352_s11 + $0xb4] ss:$8 sps:$4 sm:$0xff]   ;;  %v2150_v61 = vld [vmem:[%s2352_s11 + $0xb0] ss:$8 sps:$4 sm:$0xff]  }
  0x28   : > { %773 = vmatpush1.bf16.msra.mxu0 %v2076_v9  ;;  %2007 = vmatpush1.bf16.msra.mxu1 %v2076_v9  ;;  %v2145_v58 = vld [vmem:[%s2352_s11 + $0x1a0] ss:$8 sps:$4 sm:$0xff]   ;;  %v2148_v60 = vld [vmem:[%s2352_s11 + $0x1b4] ss:$8 sps:$4 sm:$0xff]   ;;  %v2151_v62 = vld [vmem:[%s2352_s11 + $0x1b0] ss:$8 sps:$4 sm:$0xff]  }
  0x29   : > { %774 = vmatprep.subr.bf16.mxu0 %v2256_v1  ;;  %1998 = vmatprep.subr.bf16.mxu1 %v2256_v1  ;;  %v2152_v63 = vld [vmem:[%s2352_s11 + $0xc4] ss:$8 sps:$4 sm:$0xff]   ;;  %v2157_v2 = vld [vmem:[%s2352_s11 + $0x1c0] ss:$8 sps:$4 sm:$0xff]   ;;  %v2158_v3 = vld [vmem:[%s2352_s11 + $0xd4] ss:$8 sps:$4 sm:$0xff]  }
  0x2a   : > { %v2154_v0 = vld [vmem:[%s2352_s11 + $0x1c4] ss:$8 sps:$4 sm:$0xff]   ;;  %v2160_v4 = vld [vmem:[%s2352_s11 + $0x1d4] ss:$8 sps:$4 sm:$0xff]   ;;  %v2162_v5 = vld [vmem:[%s2352_s11 + $0xd0] ss:$8 sps:$4 sm:$0xff]  }
  0x2b   : > { %v2163_v6 = vld [vmem:[%s2352_s11 + $0x1d0] ss:$8 sps:$4 sm:$0xff]   ;;  %v2164_v7 = vld [vmem:[%s2352_s11 + $0xe4] ss:$8 sps:$4 sm:$0xff]   ;;  %v2168_v9 = vld [vmem:[%s2352_s11 + $0xe0] ss:$8 sps:$4 sm:$0xff]  }
  0x2c   : > { %775 = vmatpush1.bf16.msra.mxu0 %v2077_v10  ;;  %2008 = vmatpush1.bf16.msra.mxu1 %v2077_v10  ;;  %v2166_v8 = vld [vmem:[%s2352_s11 + $0x1e4] ss:$8 sps:$4 sm:$0xff]   ;;  %v2169_v10 = vld [vmem:[%s2352_s11 + $0x1e0] ss:$8 sps:$4 sm:$0xff]   ;;  %v2170_v11 = vld [vmem:[%s2352_s11 + $0xf4] ss:$8 sps:$4 sm:$0xff]  }
  0x2d   : > { %776 = vmatprep.subr.bf16.mxu0 %v2256_v1  ;;  %1999 = vmatprep.subr.bf16.mxu1 %v2256_v1  ;;  %v2172_v12 = vld [vmem:[%s2352_s11 + $0x1f4] ss:$8 sps:$4 sm:$0xff]   ;;  %v2175_v14 = vld [vmem:[%s2352_s11 + $0x1f0] ss:$8 sps:$4 sm:$0xff]  }
  0x30   : > { %777 = vmatpush1.bf16.msra.mxu0 %v2078_v13  ;;  %2009 = vmatpush1.bf16.msra.mxu1 %v2078_v13  ;;  %v2174_v13 = vld [vmem:[%s2352_s11 + $0xf0] ss:$8 sps:$4 sm:$0xff]  }
  0x31   : > { %778 = vmatprep.subr.bf16.mxu0 %v2256_v1  ;;  %2000 = vmatprep.subr.bf16.mxu1 %v2256_v1  ;;  %v2156_v1 = vld [vmem:[%s2352_s11 + $0xc0] ss:$8 sps:$4 sm:$0xff]   ;;  %s2480_s11 = scalar_lea.vmem [#allocation2], %s1554_s10 }
  0x32   : > { %s1448_s19 = sshll.u32 %s2480_s11, 4  ;;  %s2579_s19 = int_to_ptr.vmem [resolvable:$true] %s1448_s19 }
  0x33   : > { %s2176_s27 = scalar_lea.vmem %s2579_s19, 4096  ;;  %p2183_p1 = scmp.lt.s32.totalorder %s2579_s19, %s2181_s29 }
  0x34   : > { %779 = vmatpush1.bf16.msra.mxu0 %v758_v16  ;;  %2010 = vmatpush1.bf16.msra.mxu1 %v758_v16  ;;  %p2177_p12 = scmp.ne.s32.totalorder %s2579_s19, %s2176_s27  ;;  %p2184_p2 = scmp.lt.s32.totalorder %s2182_s30, %s2176_s27 }
  0x36   : > { %p2178_p13 = pnand %p2177_p12, %p2321_p4  ;;  %p2185_p3 = por %p2184_p2, %p2183_p1 }
  0x37   : > { %793 = vmatmul.mubr.bf16.vlgmr.msra.gmra.mrb[0].mxu0 %v2080_v17  ;;  %921 = vmatmul.mubr.bf16.vlgmr.msra.gmra.mrb[0].mxu1 %v2083_v18 }
  0x38   : > { %1634 = vmatprep.mubr.msk.bf16.mxu0 %vm656_vm0, %v2086_v19  ;;  %1650 = vmatprep.mubr.msk.bf16.mxu1 %vm656_vm0, %v2088_v20  ;;  %p2179_p0 = pneg %p2178_p13 }
  0x3a   : > { %p2186_p5 = pnand %p2185_p3, %p2179_p0 }
  0x3f   : > { %801 = vmatmul.mubr.bf16.gmra.mrb[4].mxu0 %v2090_v21  ;;  %929 = vmatmul.mubr.bf16.gmra.mrb[4].mxu1 %v2091_v22 }
  0x40   : > { %1635 = vmatprep.mubr.msk.bf16.mxu0 %vm656_vm0, %v2092_v23  ;;  %1651 = vmatprep.mubr.msk.bf16.mxu1 %vm656_vm0, %v2094_v24 }
  0x47   : > { %809 = vmatmul.mubr.bf16.gmra.mrb[8].mxu0 %v2096_v25  ;;  %937 = vmatmul.mubr.bf16.gmra.mrb[8].mxu1 %v2097_v26 }
  0x48   : > { %1636 = vmatprep.mubr.msk.bf16.mxu0 %vm656_vm0, %v2098_v27  ;;  %1652 = vmatprep.mubr.msk.bf16.mxu1 %vm656_vm0, %v2100_v28 }
  0x4f   : > { %817 = vmatmul.mubr.bf16.gmra.mrb[12].mxu0 %v2102_v29  ;;  %945 = vmatmul.mubr.bf16.gmra.mrb[12].mxu1 %v2103_v30 }
  0x50   : > { %1637 = vmatprep.mubr.msk.bf16.mxu0 %vm656_vm0, %v2104_v31  ;;  %1653 = vmatprep.mubr.msk.bf16.mxu1 %vm656_vm0, %v2106_v32 }
  0x57   : > { %825 = vmatmul.mubr.bf16.gmra.mrb[16].mxu0 %v2108_v33  ;;  %953 = vmatmul.mubr.bf16.gmra.mrb[16].mxu1 %v2109_v34 }
  0x58   : > { %1638 = vmatprep.mubr.msk.bf16.mxu0 %vm656_vm0, %v2110_v35  ;;  %1654 = vmatprep.mubr.msk.bf16.mxu1 %vm656_vm0, %v2112_v36 }
  0x5f   : > { %833 = vmatmul.mubr.bf16.gmra.mrb[20].mxu0 %v2114_v37  ;;  %961 = vmatmul.mubr.bf16.gmra.mrb[20].mxu1 %v2115_v38 }
  0x60   : > { %1639 = vmatprep.mubr.msk.bf16.mxu0 %vm656_vm0, %v2116_v39  ;;  %1655 = vmatprep.mubr.msk.bf16.mxu1 %vm656_vm0, %v2118_v40 }
  0x67   : > { %841 = vmatmul.mubr.bf16.gmra.mrb[24].mxu0 %v2120_v41  ;;  %969 = vmatmul.mubr.bf16.gmra.mrb[24].mxu1 %v2121_v42 }
  0x68   : > { %1640 = vmatprep.mubr.msk.bf16.mxu0 %vm656_vm0, %v2122_v43  ;;  %1656 = vmatprep.mubr.msk.bf16.mxu1 %vm656_vm0, %v2124_v44 }
  0x6f   : > { %849 = vmatmul.mubr.bf16.gmra.mrb[28].mxu0 %v2126_v45  ;;  %977 = vmatmul.mubr.bf16.gmra.mrb[28].mxu1 %v2127_v46 }
  0x70   : > { %1641 = vmatprep.mubr.msk.bf16.mxu0 %vm656_vm0, %v2128_v47  ;;  %1657 = vmatprep.mubr.msk.bf16.mxu1 %vm656_vm0, %v2130_v48 }
  0x77   : > { %857 = vmatmul.mubr.bf16.gmra.mrb[32].mxu0 %v2132_v49  ;;  %985 = vmatmul.mubr.bf16.gmra.mrb[32].mxu1 %v2133_v50 }
  0x78   : > { %1642 = vmatprep.mubr.msk.bf16.mxu0 %vm656_vm0, %v2134_v51  ;;  %1658 = vmatprep.mubr.msk.bf16.mxu1 %vm656_vm0, %v2136_v52 }
  0x7f   : > { %865 = vmatmul.mubr.bf16.gmra.mrb[36].mxu0 %v2138_v53  ;;  %993 = vmatmul.mubr.bf16.gmra.mrb[36].mxu1 %v2139_v54 }
  0x80   : > { %1643 = vmatprep.mubr.msk.bf16.mxu0 %vm656_vm0, %v2140_v55  ;;  %1659 = vmatprep.mubr.msk.bf16.mxu1 %vm656_vm0, %v2142_v56 }
  0x87   : > { %873 = vmatmul.mubr.bf16.gmra.mrb[40].mxu0 %v2144_v57  ;;  %1001 = vmatmul.mubr.bf16.gmra.mrb[40].mxu1 %v2145_v58 }
  0x88   : > { %1644 = vmatprep.mubr.msk.bf16.mxu0 %vm656_vm0, %v2146_v59  ;;  %1660 = vmatprep.mubr.msk.bf16.mxu1 %vm656_vm0, %v2148_v60 }
  0x8f   : > { %881 = vmatmul.mubr.bf16.gmra.mrb[44].mxu0 %v2150_v61  ;;  %1009 = vmatmul.mubr.bf16.gmra.mrb[44].mxu1 %v2151_v62 }
  0x90   : > { %1645 = vmatprep.mubr.msk.bf16.mxu0 %vm656_vm0, %v2152_v63  ;;  %1661 = vmatprep.mubr.msk.bf16.mxu1 %vm656_vm0, %v2154_v0 }
  0x97   : > { %889 = vmatmul.mubr.bf16.gmra.mrb[48].mxu0 %v2156_v1  ;;  %1017 = vmatmul.mubr.bf16.gmra.mrb[48].mxu1 %v2157_v2 }
  0x98   : > { %1646 = vmatprep.mubr.msk.bf16.mxu0 %vm656_vm0, %v2158_v3  ;;  %1662 = vmatprep.mubr.msk.bf16.mxu1 %vm656_vm0, %v2160_v4 }
  0x9f   : > { %897 = vmatmul.mubr.bf16.gmra.mrb[52].mxu0 %v2162_v5  ;;  %1025 = vmatmul.mubr.bf16.gmra.mrb[52].mxu1 %v2163_v6 }
  0xa0   : > { %1647 = vmatprep.mubr.msk.bf16.mxu0 %vm656_vm0, %v2164_v7  ;;  %1663 = vmatprep.mubr.msk.bf16.mxu1 %vm656_vm0, %v2166_v8 }
  0xa7   : > { %905 = vmatmul.mubr.bf16.gmra.mrb[56].mxu0 %v2168_v9  ;;  %1033 = vmatmul.mubr.bf16.gmra.mrb[56].mxu1 %v2169_v10 }
  0xa8   : > { %1648 = vmatprep.mubr.msk.bf16.mxu0 %vm656_vm0, %v2170_v11  ;;  %1664 = vmatprep.mubr.msk.bf16.mxu1 %vm656_vm0, %v2172_v12 }
  0xaf   : > { %913 = vmatmul.mubr.bf16.gmra.mrb[60].mxu0 %v2174_v13  ;;  %1041 = vmatmul.mubr.bf16.gmra.mrb[60].mxu1 %v2175_v14 }
 0x10a   : > { %v794_v16 = vpop.f32.mrb[0].mxu0  ;;  %v922_v17 = vpop.f32.mrb[0].mxu1 }
 0x10b   : > { %v795_v18 = vadd.f32 %v2471_v15, %v794_v16  ;;  %v923_v19 = vadd.f32 %v2471_v15, %v922_v17  ;;  %v796_v20 = vpop.f32.mrb[1].mxu0  ;;  %v924_v21 = vpop.f32.mrb[1].mxu1 }
 0x10c   : > { %v797_v22 = vpop.f32.mrb[2].mxu0  ;;  %v925_v23 = vpop.f32.mrb[2].mxu1 }
 0x10d   : > { %v798_v24 = vadd.f32 %v2471_v15, %v797_v22  ;;  %v926_v25 = vadd.f32 %v2471_v15, %v925_v23  ;;  %v799_v26 = vpop.f32.mrb[3].mxu0  ;;  %v927_v27 = vpop.f32.mrb[3].mxu1  ;;  %v1049_v28 = vmax.f32 %v795_v18, 0.0  ;;  %v1081_v29 = vmax.f32 %v923_v19, 0.0 }
 0x10f   : > { %v1050_v30 = vmax.f32 %v798_v24, 0.0  ;;  %v1082_v31 = vmax.f32 %v926_v25, 0.0 }
 0x111   : > { %v1803_v32 = vpack.c.bf16 %v1050_v30, %v1049_v28  ;;  %v1883_v33 = vpack.c.bf16 %v1082_v31, %v1081_v29 }
 0x112   : > { %v802_v34 = vpop.f32.mrb[4].mxu0  ;;  %v930_v35 = vpop.f32.mrb[4].mxu1 }
 0x113   : > { %1804 = vst [vmem:[%s2480_s11] sm:$0xff] %v1803_v32   ;;  %1975 = vst [vmem:[%s2480_s11 + $0x80] sm:$0xff] %v1883_v33   ;;  %v803_v36 = vadd.f32 %v2471_v15, %v802_v34  ;;  %v931_v37 = vadd.f32 %v2471_v15, %v930_v35  ;;  %v804_v38 = vpop.f32.mrb[5].mxu0  ;;  %v932_v39 = vpop.f32.mrb[5].mxu1 }
 0x114   : > { %v805_v40 = vpop.f32.mrb[6].mxu0  ;;  %v933_v41 = vpop.f32.mrb[6].mxu1 }
 0x115   : > { %v806_v42 = vadd.f32 %v2471_v15, %v805_v40  ;;  %v934_v43 = vadd.f32 %v2471_v15, %v933_v41  ;;  %v807_v44 = vpop.f32.mrb[7].mxu0  ;;  %v935_v45 = vpop.f32.mrb[7].mxu1  ;;  %v1051_v46 = vmax.f32 %v803_v36, 0.0  ;;  %v1083_v47 = vmax.f32 %v931_v37, 0.0 }
 0x117   : > { %v1052_v48 = vmax.f32 %v806_v42, 0.0  ;;  %v1084_v49 = vmax.f32 %v934_v43, 0.0 }
 0x119   : > { %v1808_v50 = vpack.c.bf16 %v1052_v48, %v1051_v46  ;;  %v1888_v51 = vpack.c.bf16 %v1084_v49, %v1083_v47 }
 0x11a   : > { %v810_v52 = vpop.f32.mrb[8].mxu0  ;;  %v938_v53 = vpop.f32.mrb[8].mxu1 }
 0x11b   : > { %1960 = vst [vmem:[%s2480_s11 + $0x8] sm:$0xff] %v1808_v50   ;;  %1976 = vst [vmem:[%s2480_s11 + $0x88] sm:$0xff] %v1888_v51   ;;  %v811_v54 = vadd.f32 %v2471_v15, %v810_v52  ;;  %v939_v55 = vadd.f32 %v2471_v15, %v938_v53  ;;  %v812_v56 = vpop.f32.mrb[9].mxu0  ;;  %v940_v57 = vpop.f32.mrb[9].mxu1 }
 0x11c   : > { %v813_v58 = vpop.f32.mrb[10].mxu0  ;;  %v941_v59 = vpop.f32.mrb[10].mxu1 }
 0x11d   : > { %v814_v60 = vadd.f32 %v2471_v15, %v813_v58  ;;  %v942_v61 = vadd.f32 %v2471_v15, %v941_v59  ;;  %v815_v62 = vpop.f32.mrb[11].mxu0  ;;  %v943_v63 = vpop.f32.mrb[11].mxu1  ;;  %v1053_v0 = vmax.f32 %v811_v54, 0.0  ;;  %v1085_v1 = vmax.f32 %v939_v55, 0.0 }
 0x11f   : > { %v1054_v2 = vmax.f32 %v814_v60, 0.0  ;;  %v1086_v3 = vmax.f32 %v942_v61, 0.0 }
 0x121   : > { %v1813_v4 = vpack.c.bf16 %v1054_v2, %v1053_v0  ;;  %v1893_v5 = vpack.c.bf16 %v1086_v3, %v1085_v1 }
 0x122   : > { %v818_v6 = vpop.f32.mrb[12].mxu0  ;;  %v946_v7 = vpop.f32.mrb[12].mxu1 }
 0x123   : > { %1961 = vst [vmem:[%s2480_s11 + $0x10] sm:$0xff] %v1813_v4   ;;  %1977 = vst [vmem:[%s2480_s11 + $0x90] sm:$0xff] %v1893_v5   ;;  %v819_v8 = vadd.f32 %v2471_v15, %v818_v6  ;;  %v947_v9 = vadd.f32 %v2471_v15, %v946_v7  ;;  %v820_v10 = vpop.f32.mrb[13].mxu0  ;;  %v948_v11 = vpop.f32.mrb[13].mxu1 }
 0x124   : > { %v821_v12 = vpop.f32.mrb[14].mxu0  ;;  %v949_v13 = vpop.f32.mrb[14].mxu1 }
 0x125   : > { %v822_v14 = vadd.f32 %v2471_v15, %v821_v12  ;;  %v950_v16 = vadd.f32 %v2471_v15, %v949_v13  ;;  %v823_v17 = vpop.f32.mrb[15].mxu0  ;;  %v951_v18 = vpop.f32.mrb[15].mxu1  ;;  %v1055_v19 = vmax.f32 %v819_v8, 0.0  ;;  %v1087_v20 = vmax.f32 %v947_v9, 0.0 }
 0x127   : > { %v1056_v21 = vmax.f32 %v822_v14, 0.0  ;;  %v1088_v22 = vmax.f32 %v950_v16, 0.0 }
 0x129   : > { %v1818_v23 = vpack.c.bf16 %v1056_v21, %v1055_v19  ;;  %v1898_v24 = vpack.c.bf16 %v1088_v22, %v1087_v20 }
 0x12a   : > { %v826_v25 = vpop.f32.mrb[16].mxu0  ;;  %v954_v26 = vpop.f32.mrb[16].mxu1 }
 0x12b   : > { %1962 = vst [vmem:[%s2480_s11 + $0x18] sm:$0xff] %v1818_v23   ;;  %1978 = vst [vmem:[%s2480_s11 + $0x98] sm:$0xff] %v1898_v24   ;;  %v827_v27 = vadd.f32 %v2471_v15, %v826_v25  ;;  %v955_v28 = vadd.f32 %v2471_v15, %v954_v26  ;;  %v828_v29 = vpop.f32.mrb[17].mxu0  ;;  %v956_v30 = vpop.f32.mrb[17].mxu1 }
 0x12c   : > { %v829_v31 = vpop.f32.mrb[18].mxu0  ;;  %v957_v32 = vpop.f32.mrb[18].mxu1 }
 0x12d   : > { %v830_v33 = vadd.f32 %v2471_v15, %v829_v31  ;;  %v958_v34 = vadd.f32 %v2471_v15, %v957_v32  ;;  %v831_v35 = vpop.f32.mrb[19].mxu0  ;;  %v959_v36 = vpop.f32.mrb[19].mxu1  ;;  %v1057_v37 = vmax.f32 %v827_v27, 0.0  ;;  %v1089_v38 = vmax.f32 %v955_v28, 0.0 }
 0x12f   : > { %v1058_v39 = vmax.f32 %v830_v33, 0.0  ;;  %v1090_v40 = vmax.f32 %v958_v34, 0.0 }
 0x131   : > { %v1823_v41 = vpack.c.bf16 %v1058_v39, %v1057_v37  ;;  %v1903_v42 = vpack.c.bf16 %v1090_v40, %v1089_v38 }
 0x132   : > { %v834_v43 = vpop.f32.mrb[20].mxu0  ;;  %v962_v44 = vpop.f32.mrb[20].mxu1 }
 0x133   : > { %1963 = vst [vmem:[%s2480_s11 + $0x20] sm:$0xff] %v1823_v41   ;;  %1979 = vst [vmem:[%s2480_s11 + $0xa0] sm:$0xff] %v1903_v42   ;;  %v835_v45 = vadd.f32 %v2471_v15, %v834_v43  ;;  %v963_v46 = vadd.f32 %v2471_v15, %v962_v44  ;;  %v836_v47 = vpop.f32.mrb[21].mxu0  ;;  %v964_v48 = vpop.f32.mrb[21].mxu1 }
 0x134   : > { %v837_v49 = vpop.f32.mrb[22].mxu0  ;;  %v965_v50 = vpop.f32.mrb[22].mxu1 }
 0x135   : > { %v838_v51 = vadd.f32 %v2471_v15, %v837_v49  ;;  %v966_v52 = vadd.f32 %v2471_v15, %v965_v50  ;;  %v839_v53 = vpop.f32.mrb[23].mxu0  ;;  %v967_v54 = vpop.f32.mrb[23].mxu1  ;;  %v1059_v55 = vmax.f32 %v835_v45, 0.0  ;;  %v1091_v56 = vmax.f32 %v963_v46, 0.0 }
 0x137   : > { %v1060_v57 = vmax.f32 %v838_v51, 0.0  ;;  %v1092_v58 = vmax.f32 %v966_v52, 0.0 }
 0x139   : > { %v1828_v59 = vpack.c.bf16 %v1060_v57, %v1059_v55  ;;  %v1908_v60 = vpack.c.bf16 %v1092_v58, %v1091_v56 }
 0x13a   : > { %v842_v61 = vpop.f32.mrb[24].mxu0  ;;  %v970_v62 = vpop.f32.mrb[24].mxu1 }
 0x13b   : > { %1964 = vst [vmem:[%s2480_s11 + $0x28] sm:$0xff] %v1828_v59   ;;  %1980 = vst [vmem:[%s2480_s11 + $0xa8] sm:$0xff] %v1908_v60   ;;  %v843_v63 = vadd.f32 %v2471_v15, %v842_v61  ;;  %v971_v0 = vadd.f32 %v2471_v15, %v970_v62  ;;  %v844_v1 = vpop.f32.mrb[25].mxu0  ;;  %v972_v2 = vpop.f32.mrb[25].mxu1 }
 0x13c   : > { %v845_v3 = vpop.f32.mrb[26].mxu0  ;;  %v973_v4 = vpop.f32.mrb[26].mxu1 }
 0x13d   : > { %v846_v5 = vadd.f32 %v2471_v15, %v845_v3  ;;  %v974_v6 = vadd.f32 %v2471_v15, %v973_v4  ;;  %v847_v7 = vpop.f32.mrb[27].mxu0  ;;  %v975_v8 = vpop.f32.mrb[27].mxu1  ;;  %v1061_v9 = vmax.f32 %v843_v63, 0.0  ;;  %v1093_v10 = vmax.f32 %v971_v0, 0.0 }
 0x13f   : > { %v1062_v11 = vmax.f32 %v846_v5, 0.0  ;;  %v1094_v12 = vmax.f32 %v974_v6, 0.0 }
 0x141   : > { %v1833_v13 = vpack.c.bf16 %v1062_v11, %v1061_v9  ;;  %v1913_v14 = vpack.c.bf16 %v1094_v12, %v1093_v10 }
 0x142   : > { %v850_v16 = vpop.f32.mrb[28].mxu0  ;;  %v978_v17 = vpop.f32.mrb[28].mxu1 }
 0x143   : > { %1965 = vst [vmem:[%s2480_s11 + $0x30] sm:$0xff] %v1833_v13   ;;  %1981 = vst [vmem:[%s2480_s11 + $0xb0] sm:$0xff] %v1913_v14   ;;  %v851_v18 = vadd.f32 %v2471_v15, %v850_v16  ;;  %v979_v19 = vadd.f32 %v2471_v15, %v978_v17  ;;  %v852_v20 = vpop.f32.mrb[29].mxu0  ;;  %v980_v21 = vpop.f32.mrb[29].mxu1 }
 0x144   : > { %v853_v22 = vpop.f32.mrb[30].mxu0  ;;  %v981_v23 = vpop.f32.mrb[30].mxu1 }
 0x145   : > { %v854_v24 = vadd.f32 %v2471_v15, %v853_v22  ;;  %v982_v25 = vadd.f32 %v2471_v15, %v981_v23  ;;  %v855_v26 = vpop.f32.mrb[31].mxu0  ;;  %v983_v27 = vpop.f32.mrb[31].mxu1  ;;  %v1063_v28 = vmax.f32 %v851_v18, 0.0  ;;  %v1095_v29 = vmax.f32 %v979_v19, 0.0 }
 0x147   : > { %v1064_v30 = vmax.f32 %v854_v24, 0.0  ;;  %v1096_v31 = vmax.f32 %v982_v25, 0.0 }
 0x149   : > { %v1838_v32 = vpack.c.bf16 %v1064_v30, %v1063_v28  ;;  %v1918_v33 = vpack.c.bf16 %v1096_v31, %v1095_v29 }
 0x14a   : > { %v858_v34 = vpop.f32.mrb[32].mxu0  ;;  %v986_v35 = vpop.f32.mrb[32].mxu1 }
 0x14b   : > { %1966 = vst [vmem:[%s2480_s11 + $0x38] sm:$0xff] %v1838_v32   ;;  %1982 = vst [vmem:[%s2480_s11 + $0xb8] sm:$0xff] %v1918_v33   ;;  %v859_v36 = vadd.f32 %v2471_v15, %v858_v34  ;;  %v987_v37 = vadd.f32 %v2471_v15, %v986_v35  ;;  %v860_v38 = vpop.f32.mrb[33].mxu0  ;;  %v988_v39 = vpop.f32.mrb[33].mxu1 }
 0x14c   : > { %v861_v40 = vpop.f32.mrb[34].mxu0  ;;  %v989_v41 = vpop.f32.mrb[34].mxu1 }
 0x14d   : > { %v862_v42 = vadd.f32 %v2471_v15, %v861_v40  ;;  %v990_v43 = vadd.f32 %v2471_v15, %v989_v41  ;;  %v863_v44 = vpop.f32.mrb[35].mxu0  ;;  %v991_v45 = vpop.f32.mrb[35].mxu1  ;;  %v1065_v46 = vmax.f32 %v859_v36, 0.0  ;;  %v1097_v47 = vmax.f32 %v987_v37, 0.0 }
 0x14f   : > { %v1066_v48 = vmax.f32 %v862_v42, 0.0  ;;  %v1098_v49 = vmax.f32 %v990_v43, 0.0 }
 0x151   : > { %v1843_v50 = vpack.c.bf16 %v1066_v48, %v1065_v46  ;;  %v1923_v51 = vpack.c.bf16 %v1098_v49, %v1097_v47 }
 0x152   : > { %v866_v52 = vpop.f32.mrb[36].mxu0  ;;  %v994_v53 = vpop.f32.mrb[36].mxu1 }
 0x153   : > { %1967 = vst [vmem:[%s2480_s11 + $0x40] sm:$0xff] %v1843_v50   ;;  %1983 = vst [vmem:[%s2480_s11 + $0xc0] sm:$0xff] %v1923_v51   ;;  %v867_v54 = vadd.f32 %v2471_v15, %v866_v52  ;;  %v995_v55 = vadd.f32 %v2471_v15, %v994_v53  ;;  %v868_v56 = vpop.f32.mrb[37].mxu0  ;;  %v996_v57 = vpop.f32.mrb[37].mxu1 }
 0x154   : > { %v869_v58 = vpop.f32.mrb[38].mxu0  ;;  %v997_v59 = vpop.f32.mrb[38].mxu1 }
 0x155   : > { %v870_v60 = vadd.f32 %v2471_v15, %v869_v58  ;;  %v998_v61 = vadd.f32 %v2471_v15, %v997_v59  ;;  %v871_v62 = vpop.f32.mrb[39].mxu0  ;;  %v999_v63 = vpop.f32.mrb[39].mxu1  ;;  %v1067_v0 = vmax.f32 %v867_v54, 0.0  ;;  %v1099_v1 = vmax.f32 %v995_v55, 0.0 }
 0x157   : > { %v1068_v2 = vmax.f32 %v870_v60, 0.0  ;;  %v1100_v3 = vmax.f32 %v998_v61, 0.0 }
 0x159   : > { %v1848_v4 = vpack.c.bf16 %v1068_v2, %v1067_v0  ;;  %v1928_v5 = vpack.c.bf16 %v1100_v3, %v1099_v1 }
 0x15a   : > { %v874_v6 = vpop.f32.mrb[40].mxu0  ;;  %v1002_v7 = vpop.f32.mrb[40].mxu1 }
 0x15b   : > { %1968 = vst [vmem:[%s2480_s11 + $0x48] sm:$0xff] %v1848_v4   ;;  %1984 = vst [vmem:[%s2480_s11 + $0xc8] sm:$0xff] %v1928_v5   ;;  %v875_v8 = vadd.f32 %v2471_v15, %v874_v6  ;;  %v1003_v9 = vadd.f32 %v2471_v15, %v1002_v7  ;;  %v876_v10 = vpop.f32.mrb[41].mxu0  ;;  %v1004_v11 = vpop.f32.mrb[41].mxu1 }
 0x15c   : > { %v877_v12 = vpop.f32.mrb[42].mxu0  ;;  %v1005_v13 = vpop.f32.mrb[42].mxu1 }
 0x15d   : > { %v878_v14 = vadd.f32 %v2471_v15, %v877_v12  ;;  %v1006_v16 = vadd.f32 %v2471_v15, %v1005_v13  ;;  %v879_v17 = vpop.f32.mrb[43].mxu0  ;;  %v1007_v18 = vpop.f32.mrb[43].mxu1  ;;  %v1069_v19 = vmax.f32 %v875_v8, 0.0  ;;  %v1101_v20 = vmax.f32 %v1003_v9, 0.0 }
 0x15f   : > { %v1070_v21 = vmax.f32 %v878_v14, 0.0  ;;  %v1102_v22 = vmax.f32 %v1006_v16, 0.0 }
 0x161   : > { %v1853_v23 = vpack.c.bf16 %v1070_v21, %v1069_v19  ;;  %v1933_v24 = vpack.c.bf16 %v1102_v22, %v1101_v20 }
 0x162   : > { %v882_v25 = vpop.f32.mrb[44].mxu0  ;;  %v1010_v26 = vpop.f32.mrb[44].mxu1 }
 0x163   : > { %1969 = vst [vmem:[%s2480_s11 + $0x50] sm:$0xff] %v1853_v23   ;;  %1985 = vst [vmem:[%s2480_s11 + $0xd0] sm:$0xff] %v1933_v24   ;;  %v883_v27 = vadd.f32 %v2471_v15, %v882_v25  ;;  %v1011_v28 = vadd.f32 %v2471_v15, %v1010_v26  ;;  %v884_v29 = vpop.f32.mrb[45].mxu0  ;;  %v1012_v30 = vpop.f32.mrb[45].mxu1 }
 0x164   : > { %v885_v31 = vpop.f32.mrb[46].mxu0  ;;  %v1013_v32 = vpop.f32.mrb[46].mxu1 }
 0x165   : > { %v886_v33 = vadd.f32 %v2471_v15, %v885_v31  ;;  %v1014_v34 = vadd.f32 %v2471_v15, %v1013_v32  ;;  %v887_v35 = vpop.f32.mrb[47].mxu0  ;;  %v1015_v36 = vpop.f32.mrb[47].mxu1  ;;  %v1071_v37 = vmax.f32 %v883_v27, 0.0  ;;  %v1103_v38 = vmax.f32 %v1011_v28, 0.0 }
 0x167   : > { %v1072_v39 = vmax.f32 %v886_v33, 0.0  ;;  %v1104_v40 = vmax.f32 %v1014_v34, 0.0 }
 0x169   : > { %v1858_v41 = vpack.c.bf16 %v1072_v39, %v1071_v37  ;;  %v1938_v42 = vpack.c.bf16 %v1104_v40, %v1103_v38 }
 0x16a   : > { %v890_v43 = vpop.f32.mrb[48].mxu0  ;;  %v1018_v44 = vpop.f32.mrb[48].mxu1 }
 0x16b   : > { %1970 = vst [vmem:[%s2480_s11 + $0x58] sm:$0xff] %v1858_v41   ;;  %1986 = vst [vmem:[%s2480_s11 + $0xd8] sm:$0xff] %v1938_v42   ;;  %v891_v45 = vadd.f32 %v2471_v15, %v890_v43  ;;  %v1019_v46 = vadd.f32 %v2471_v15, %v1018_v44  ;;  %v892_v47 = vpop.f32.mrb[49].mxu0  ;;  %v1020_v48 = vpop.f32.mrb[49].mxu1 }
 0x16c   : > { %v893_v49 = vpop.f32.mrb[50].mxu0  ;;  %v1021_v50 = vpop.f32.mrb[50].mxu1 }
 0x16d   : > { %v894_v51 = vadd.f32 %v2471_v15, %v893_v49  ;;  %v1022_v52 = vadd.f32 %v2471_v15, %v1021_v50  ;;  %v895_v53 = vpop.f32.mrb[51].mxu0  ;;  %v1023_v54 = vpop.f32.mrb[51].mxu1  ;;  %v1073_v55 = vmax.f32 %v891_v45, 0.0  ;;  %v1105_v56 = vmax.f32 %v1019_v46, 0.0 }
 0x16f   : > { %v1074_v57 = vmax.f32 %v894_v51, 0.0  ;;  %v1106_v58 = vmax.f32 %v1022_v52, 0.0 }
 0x171   : > { %v1863_v59 = vpack.c.bf16 %v1074_v57, %v1073_v55  ;;  %v1943_v60 = vpack.c.bf16 %v1106_v58, %v1105_v56 }
 0x172   : > { %v898_v61 = vpop.f32.mrb[52].mxu0  ;;  %v1026_v62 = vpop.f32.mrb[52].mxu1 }
 0x173   : > { %1971 = vst [vmem:[%s2480_s11 + $0x60] sm:$0xff] %v1863_v59   ;;  %1987 = vst [vmem:[%s2480_s11 + $0xe0] sm:$0xff] %v1943_v60   ;;  %v899_v63 = vadd.f32 %v2471_v15, %v898_v61  ;;  %v1027_v0 = vadd.f32 %v2471_v15, %v1026_v62  ;;  %v900_v1 = vpop.f32.mrb[53].mxu0  ;;  %v1028_v2 = vpop.f32.mrb[53].mxu1 }
 0x174   : > { %v901_v3 = vpop.f32.mrb[54].mxu0  ;;  %v1029_v4 = vpop.f32.mrb[54].mxu1 }
 0x175   : > { %v902_v5 = vadd.f32 %v2471_v15, %v901_v3  ;;  %v1030_v6 = vadd.f32 %v2471_v15, %v1029_v4  ;;  %v903_v7 = vpop.f32.mrb[55].mxu0  ;;  %v1031_v8 = vpop.f32.mrb[55].mxu1  ;;  %v1075_v9 = vmax.f32 %v899_v63, 0.0  ;;  %v1107_v10 = vmax.f32 %v1027_v0, 0.0 }
 0x177   : > { %v1076_v11 = vmax.f32 %v902_v5, 0.0  ;;  %v1108_v12 = vmax.f32 %v1030_v6, 0.0 }
 0x179   : > { %v1868_v13 = vpack.c.bf16 %v1076_v11, %v1075_v9  ;;  %v1948_v14 = vpack.c.bf16 %v1108_v12, %v1107_v10 }
 0x17a   : > { %v906_v16 = vpop.f32.mrb[56].mxu0  ;;  %v1034_v17 = vpop.f32.mrb[56].mxu1 }
 0x17b   : > { %1972 = vst [vmem:[%s2480_s11 + $0x68] sm:$0xff] %v1868_v13   ;;  %1988 = vst [vmem:[%s2480_s11 + $0xe8] sm:$0xff] %v1948_v14   ;;  %v907_v18 = vadd.f32 %v2471_v15, %v906_v16  ;;  %v1035_v19 = vadd.f32 %v2471_v15, %v1034_v17  ;;  %v908_v20 = vpop.f32.mrb[57].mxu0  ;;  %v1036_v21 = vpop.f32.mrb[57].mxu1 }
 0x17c   : > { %v909_v22 = vpop.f32.mrb[58].mxu0  ;;  %v1037_v23 = vpop.f32.mrb[58].mxu1 }
 0x17d   : > { %v910_v24 = vadd.f32 %v2471_v15, %v909_v22  ;;  %v1038_v25 = vadd.f32 %v2471_v15, %v1037_v23  ;;  %v911_v26 = vpop.f32.mrb[59].mxu0  ;;  %v1039_v27 = vpop.f32.mrb[59].mxu1  ;;  %v1077_v28 = vmax.f32 %v907_v18, 0.0  ;;  %v1109_v29 = vmax.f32 %v1035_v19, 0.0 }
 0x17f   : > { %v1078_v30 = vmax.f32 %v910_v24, 0.0  ;;  %v1110_v31 = vmax.f32 %v1038_v25, 0.0 }
 0x181   : > { %v1873_v32 = vpack.c.bf16 %v1078_v30, %v1077_v28  ;;  %v1953_v33 = vpack.c.bf16 %v1110_v31, %v1109_v29 }
 0x182   : > { %v914_v34 = vpop.f32.mrb[60].mxu0  ;;  %v1042_v35 = vpop.f32.mrb[60].mxu1 }
 0x183   : > { %1973 = vst [vmem:[%s2480_s11 + $0x70] sm:$0xff] %v1873_v32   ;;  %1989 = vst [vmem:[%s2480_s11 + $0xf0] sm:$0xff] %v1953_v33   ;;  %v915_v36 = vadd.f32 %v2471_v15, %v914_v34  ;;  %v1043_v37 = vadd.f32 %v2471_v15, %v1042_v35  ;;  %v916_v38 = vpop.f32.mrb[61].mxu0  ;;  %v1044_v39 = vpop.f32.mrb[61].mxu1 }
 0x184   : > { %v917_v40 = vpop.f32.mrb[62].mxu0  ;;  %v1045_v41 = vpop.f32.mrb[62].mxu1 }
 0x185   : > { %v918_v42 = vadd.f32 %v2471_v15, %v917_v40  ;;  %v1046_v43 = vadd.f32 %v2471_v15, %v1045_v41  ;;  %v919_v44 = vpop.f32.mrb[63].mxu0  ;;  %v1047_v45 = vpop.f32.mrb[63].mxu1  ;;  %v1079_v46 = vmax.f32 %v915_v36, 0.0  ;;  %v1111_v47 = vmax.f32 %v1043_v37, 0.0 }
 0x187   : > { %v1080_v48 = vmax.f32 %v918_v42, 0.0  ;;  %v1112_v49 = vmax.f32 %v1046_v43, 0.0 }
 0x189   : > { %v1878_v15 = vpack.c.bf16 %v1080_v48, %v1079_v46  ;;  %v1958_v50 = vpack.c.bf16 %v1112_v49, %v1111_v47 }
 0x18b   : > { %1974 = vst [vmem:[%s2480_s11 + $0x78] sm:$0xff] %v1878_v15   ;;  %1990 = vst [vmem:[%s2480_s11 + $0xf8] sm:$0xff] %v1958_v50  }
 0x18c   : > { %2189 = shalt.err (!%p2186_p5)
}
 0x18d   : > { %s2190_s4 = scalar_lea.hbm %s2577_s26, 4096  ;;  %s2194_s7 = scalar_lea.hbm %s2634_s3, 16384 }
 0x18e   : > { %p2191_p6 = scmp.ne.s32.totalorder %s2577_s26, %s2190_s4  ;;  %p2195_p10 = scmp.lt.u32.totalorder %s2577_s26, %s2634_s3 }
 0x18f   : > { %p2196_p11 = scmp.lt.u32.totalorder %s2194_s7, %s2190_s4  ;;  %p2198_p13 = scmp.lt.u32.totalorder %s2190_s4, %s2577_s26 }
 0x190   : > { %p2192_p7 = pnand %p2191_p6, %p2321_p4 }
 0x191   : > { %p2197_p12 = por %p2196_p11, %p2195_p10 }
 0x192   : > { %p2193_p9 = pneg %p2192_p7 }
 0x193   : > { %p2199_p0 = por %p2198_p13, %p2197_p12 }
 0x195   : > { %p2200_p1 = pnand %p2199_p0, %p2193_p9 }
 0x197   : > { %2203 = shalt.err (!%p2200_p1)
}
 0x198   : > { %s2259_s10 = smov 64   ;;  %s2260_s11 = smov 4  }
 0x199   : > { %2011 = dma.vmem_to_hbm [thread:$0]  (%p2321_p4), %s2579_s19, 4096, %s2577_s26, %s2585_s15, %s2259_s10, %s2259_s10, %s2260_s11  }
 0x19a PF: > { %p2017_p2 = scmp.ge.s32.totalorder %s2254_s17, 2  ;;  %s1463_s18 = sand.u32 1, %s2234_s12  }
 0x19b   : > { %s1464_s21 = scalar_lea.sflag [#allocation3], %s1463_s18 }
 0x19c   : > { %p2014_p3 = pnand %p2017_p2, %p2328_p8 }
 0x19e   : > { %2229 = dma.done.wait (!%p2014_p3), %s1464_s21, 4096  }
 0x19f   : > { %2231 = vsyncadd (!%p2014_p3), %s1464_s21, 4294963200  ;;  %s16_s17 = sadd.s32 1, %s2254_s17   ;;  %s2637_s12 = smov %s2238_s13 }
 0x1a0   : > { %p13_p5 = scmp.ge.s32.totalorder %s16_s17, 6   ;;  %s2638_s13 = smov %s2242_s14 }
 0x1a1   : > { %s2639_s14 = smov %s2334_s25  ;;  %s2640_s15 = smov %s2250_s16 }
 0x1a2   : > { %s2641_s16 = smov %s2643_s20  ;;  %15 = sbr.rel (!%p13_p5) target bundleno = 4 (0x4), region = 73 }
 0x1a9   :  { %1469 = vsyncpa [#allocation3], 1 }
 0x1aa   :  { %1471 = vsyncpa [#allocation3 + $0x1], 1 }

</bundles_post_ra>
